<compile_context>
chip_gen: v5e
topology: v5e:2x2
jax: 0.10.0
libtpu: 0.0.40
codegen_flags: <defaults>
</compile_context>

<pallas_src>
import math

import jax
import jax.numpy as jnp
from jax import lax
from jax.experimental import pallas as pl
from jax.experimental.pallas import tpu as pltpu


# ----------------------------------------------------------------------------- helpers
def _round_up(x, m):
    return ((x + m - 1) // m) * m


def _vmem_capacity_bytes():
    try:
        return int(pltpu.get_tpu_info().vmem_capacity_bytes)
    except Exception:
        return 64 << 20  # conservative fallback (v7x per-core VMEM)


def _plan(B, S, c_in, c_out, weight_in_vmem):
    """Chip-aware tile plan -> (nb, tile_s, tile_co, vmem_limit_bytes)."""
    cap = _vmem_capacity_bytes()
    # Data-tile budget: half of physical VMEM (<= 32 MiB on v7x, <= 64 MiB on 128 MiB parts).
    budget = min(cap // 2, 96 << 20)

    def w_tile_bytes(tco):  # (tco, c_in) f32 tile, sublane(8)/lane(128) padded
        return _round_up(tco, 8) * _round_up(c_in, 128) * 4

    # Generality guard: tile c_out if the (double-buffered) weight tile would eat VMEM.
    tile_co = c_out
    while tile_co > 128 and 2 * w_tile_bytes(tile_co) > budget // 3:
        tile_co = max(128, _round_up(tile_co // 2, 128))

    if weight_in_vmem:
        # Mosaic double-buffers even constant blocks; count both copies of weight + bias.
        fixed = 2 * w_tile_bytes(tile_co) + 2 * _round_up(tile_co, 8) * 128 * 4
    else:
        fixed = 0  # weight/bias live in SMEM on the VPU path

    headroom = 2 << 20  # compiler internal scratch
    avail = max(budget - fixed - headroom, 1 << 20)

    ci_p = _round_up(c_in, 8)
    co_p = _round_up(tile_co, 8)
    per_col = 2 * 4 * (ci_p + co_p)  # dbl-buffered f32 x + out bytes per (batch, column)
    max_cols = min(max(avail // per_col, 128), 1 << 18)

    if S >= max_cols:
        nb = 1
        tile_s = max(128, (max_cols // 128) * 128)  # lane-aligned spatial tile
    else:
        tile_s = S                                   # full-extent spatial block
        nb = max(1, min(B, max_cols // S))           # pack batches to amortize per-step overhead

    usage = fixed + per_col * nb * tile_s + headroom
    vmem_limit = min(int(cap * 0.75), max(32 << 20, usage + (6 << 20)))
    return nb, tile_s, tile_co, vmem_limit


# ----------------------------------------------------------------------------- kernels
def _make_vpu_kernel(c_in, c_out):
    """Tiny-channel path: unrolled scalar(SMEM) x vector MAC on the VALUs."""

    def kernel(x_ref, w_ref, b_ref, o_ref):
        # x_ref: (nb, c_in, tile_s) VMEM ; w_ref: (c_out, c_in) SMEM ; b_ref: (c_out,) SMEM
        x = x_ref[...]
        rows = []
        for o in range(c_out):
            acc = x[:, 0, :] * w_ref[o, 0]
            for c in range(1, c_in):
                acc = acc + x[:, c, :] * w_ref[o, c]
            rows.append(acc + b_ref[o])
        # single lane-dense store of the whole (nb, c_out, tile_s) block
        o_ref[...] = jnp.stack(rows, axis=1).astype(o_ref.dtype)

    return kernel


def _make_mxu_kernel(nb, precision):
    """General path: resident weight tile, MXU matmul per batch row (static unroll)."""

    def kernel(x_ref, w_ref, b_ref, o_ref):
        # x_ref: (nb, c_in, tile_s) ; w_ref: (tile_co, c_in) ; b_ref: (tile_co, 1)
        w = w_ref[...]
        b = b_ref[...]
        for i in range(nb):
            acc = jnp.dot(w, x_ref[i], precision=precision,
                          preferred_element_type=jnp.float32)
            o_ref[i] = (acc + b).astype(o_ref.dtype)

    return kernel


# ----------------------------------------------------------------------------- wrapper
def linear_1x1_conv(x_nchw, weight, bias=None, *, precision=lax.Precision.HIGHEST):
    """1x1 Conv2d forward.

    x_nchw: (B, c_in, N, T) float32
    weight: (c_out, c_in)   float32 (conv weight squeezed over the 1x1 kernel)
    bias:   (c_out,)        float32 or None
    returns (B, c_out, N, T) float32
    """
    B, c_in, N, T = x_nchw.shape
    c_out = weight.shape[0]
    S = N * T

    if bias is None:
        bias = jnp.zeros((c_out,), x_nchw.dtype)

    x = x_nchw.reshape(B, c_in, S)  # free view

    # Degenerate MXU shapes (K=c_in tiny) go to the VPU fast path.
    use_vpu = (c_in <= 16) and (c_out <= 64)
    nb, tile_s, tile_co, vmem_limit = _plan(B, S, c_in, c_out, weight_in_vmem=not use_vpu)
    grid_b = pl.cdiv(B, nb)
    grid_s = pl.cdiv(S, tile_s)

    cost = pl.CostEstimate(
        flops=2 * B * S * c_in * c_out,
        transcendentals=0,
        bytes_accessed=4 * (B * c_in * S + B * c_out * S + c_out * c_in + c_out),
    )

    if use_vpu:
        kernel = _make_vpu_kernel(c_in, c_out)
        grid = (grid_b, grid_s)
        in_specs = [
            pl.BlockSpec((nb, c_in, tile_s), lambda b, s: (b, 0, s)),
            pl.BlockSpec(memory_space=pltpu.MemorySpace.SMEM),  # whole weight in SMEM
            pl.BlockSpec(memory_space=pltpu.MemorySpace.SMEM),  # whole bias in SMEM
        ]
        out_specs = pl.BlockSpec((nb, c_out, tile_s), lambda b, s: (b, 0, s))
        dims = ("parallel", "parallel")
        args = (x, weight, bias)
    else:
        kernel = _make_mxu_kernel(nb, precision)
        grid = (grid_b, pl.cdiv(c_out, tile_co), grid_s)
        in_specs = [
            pl.BlockSpec((nb, c_in, tile_s), lambda b, co, s: (b, 0, s)),
            pl.BlockSpec((tile_co, c_in), lambda b, co, s: (co, 0)),  # resident weight tile
            pl.BlockSpec((tile_co, 1), lambda b, co, s: (co, 0)),     # resident bias tile
        ]
        out_specs = pl.BlockSpec((nb, tile_co, tile_s), lambda b, co, s: (b, co, s))
        dims = ("parallel", "parallel", "parallel")
        args = (x, weight, bias.reshape(c_out, 1))

    y = pl.pallas_call(
        kernel,
        out_shape=jax.ShapeDtypeStruct((B, c_out, S), x.dtype),
        grid=grid,
        in_specs=in_specs,
        out_specs=out_specs,
        compiler_params=pltpu.CompilerParams(
            dimension_semantics=dims,
            vmem_limit_bytes=vmem_limit,
        ),
        cost_estimate=cost,
    )(*args)

    return y.reshape(B, c_out, N, T)  # free reshape back to NCHW


def init_params(key, c_in, c_out):
    """Deterministic init matching the module: xavier_uniform_ weight, uniform_ bias."""
    kw, kb = jax.random.split(key)
    bound = math.sqrt(6.0 / (c_in + c_out))  # 1x1 kernel -> fans are the channel counts
    weight = jax.random.uniform(kw, (c_out, c_in), jnp.float32, -bound, bound)
    bias = jax.random.uniform(kb, (c_out,), jnp.float32, 0.0, 1.0)
    return weight, bias


if __name__ == "__main__":
    key = jax.random.PRNGKey(0)
    k_x, k_p, k_x2, k_p2 = jax.random.split(key, 4)

    # Test 1: tiny channels (module-typical) -> VPU scalar-MAC path, nb>1 batching.
    B, c_in, c_out, num_nodes, seq_len = 2, 4, 8, 16, 8
    x = jax.random.normal(k_x, (B, c_in, num_nodes, seq_len), jnp.float32)
    weight, bias = init_params(k_p, c_in, c_out)
    out = jax.block_until_ready(linear_1x1_conv(x, weight, bias))
    ref = (jnp.einsum("bcnt,oc->bont", x, weight, precision=lax.Precision.HIGHEST)
           + bias[None, :, None, None])
    assert out.shape == (B, c_out, num_nodes, seq_len)
    assert jnp.allclose(out, ref, atol=1e-4, rtol=1e-4)

    # Test 2: larger channel counts -> MXU path with resident weight tile.
    B2, ci2, co2, n2, t2 = 2, 24, 36, 16, 16
    x2 = jax.random.normal(k_x2, (B2, ci2, n2, t2), jnp.float32)
    w2, b2 = init_params(k_p2, ci2, co2)
    out2 = jax.block_until_ready(linear_1x1_conv(x2, w2, b2))
    ref2 = (jnp.einsum("bcnt,oc->bont", x2, w2, precision=lax.Precision.HIGHEST)
            + b2[None, :, None, None])
    assert out2.shape == (B2, co2, n2, t2)
    assert jnp.allclose(out2, ref2, atol=1e-4, rtol=1e-4)

    print("KERNEL_OK")
</pallas_src>

<mosaic_0001>
module attributes {stable_mosaic.version = 11 : i64} {
  func.func @kernel(%arg0: i32, %arg1: i32, %arg2: memref<2x4x128xf32, #tpu.memory_space<vmem>>, %arg3: memref<8x4xf32, #tpu.memory_space<smem>>, %arg4: memref<8xf32, #tpu.memory_space<smem>>, %arg5: memref<2x8x128xf32, #tpu.memory_space<vmem>>) attributes {dimension_semantics = [#tpu.dimension_semantics<parallel>, #tpu.dimension_semantics<parallel>], iteration_bounds = array<i64: 1, 1>, scalar_prefetch = 0 : i64, scratch_operands = 0 : i64, tpu.core_type = #tpu.core_type<tc>, window_params = [{transform_indices = @transform_0, window_bounds = array<i64: 2, 4, 128>}, {transform_indices = @transform_1, window_bounds = array<i64: 8, 4>}, {transform_indices = @transform_2, window_bounds = array<i64: 8>}, {transform_indices = @transform_3, window_bounds = array<i64: 2, 8, 128>}]} {
    %c0 = arith.constant 0 : index
    %c0_0 = arith.constant 0 : index
    %c0_1 = arith.constant 0 : index
    %0 = vector.load %arg2[%c0, %c0_0, %c0_1] : memref<2x4x128xf32, #tpu.memory_space<vmem>>, vector<2x4x128xf32>
    %1 = vector.extract_strided_slice %0 {offsets = [0, 0, 0], sizes = [2, 1, 128], strides = [1, 1, 1]} : vector<2x4x128xf32> to vector<2x1x128xf32>
    %2 = vector.shape_cast %1 : vector<2x1x128xf32> to vector<2x128xf32>
    %c0_2 = arith.constant 0 : index
    %c0_3 = arith.constant 0 : index
    %3 = memref.load %arg3[%c0_2, %c0_3] : memref<8x4xf32, #tpu.memory_space<smem>>
    %4 = vector.broadcast %3 : f32 to vector<2x128xf32>
    %5 = arith.mulf %2, %4 : vector<2x128xf32>
    %6 = vector.extract_strided_slice %0 {offsets = [0, 1, 0], sizes = [2, 1, 128], strides = [1, 1, 1]} : vector<2x4x128xf32> to vector<2x1x128xf32>
    %7 = vector.shape_cast %6 : vector<2x1x128xf32> to vector<2x128xf32>
    %c0_4 = arith.constant 0 : index
    %c1 = arith.constant 1 : index
    %8 = memref.load %arg3[%c0_4, %c1] : memref<8x4xf32, #tpu.memory_space<smem>>
    %9 = vector.broadcast %8 : f32 to vector<2x128xf32>
    %10 = arith.mulf %7, %9 : vector<2x128xf32>
    %11 = arith.addf %5, %10 : vector<2x128xf32>
    %12 = vector.extract_strided_slice %0 {offsets = [0, 2, 0], sizes = [2, 1, 128], strides = [1, 1, 1]} : vector<2x4x128xf32> to vector<2x1x128xf32>
    %13 = vector.shape_cast %12 : vector<2x1x128xf32> to vector<2x128xf32>
    %c0_5 = arith.constant 0 : index
    %c2 = arith.constant 2 : index
    %14 = memref.load %arg3[%c0_5, %c2] : memref<8x4xf32, #tpu.memory_space<smem>>
    %15 = vector.broadcast %14 : f32 to vector<2x128xf32>
    %16 = arith.mulf %13, %15 : vector<2x128xf32>
    %17 = arith.addf %11, %16 : vector<2x128xf32>
    %18 = vector.extract_strided_slice %0 {offsets = [0, 3, 0], sizes = [2, 1, 128], strides = [1, 1, 1]} : vector<2x4x128xf32> to vector<2x1x128xf32>
    %19 = vector.shape_cast %18 : vector<2x1x128xf32> to vector<2x128xf32>
    %c0_6 = arith.constant 0 : index
    %c3 = arith.constant 3 : index
    %20 = memref.load %arg3[%c0_6, %c3] : memref<8x4xf32, #tpu.memory_space<smem>>
    %21 = vector.broadcast %20 : f32 to vector<2x128xf32>
    %22 = arith.mulf %19, %21 : vector<2x128xf32>
    %23 = arith.addf %17, %22 : vector<2x128xf32>
    %c0_7 = arith.constant 0 : index
    %24 = memref.load %arg4[%c0_7] : memref<8xf32, #tpu.memory_space<smem>>
    %25 = vector.broadcast %24 : f32 to vector<2x128xf32>
    %26 = arith.addf %23, %25 : vector<2x128xf32>
    %27 = vector.extract_strided_slice %0 {offsets = [0, 0, 0], sizes = [2, 1, 128], strides = [1, 1, 1]} : vector<2x4x128xf32> to vector<2x1x128xf32>
    %28 = vector.shape_cast %27 : vector<2x1x128xf32> to vector<2x128xf32>
    %c1_8 = arith.constant 1 : index
    %c0_9 = arith.constant 0 : index
    %29 = memref.load %arg3[%c1_8, %c0_9] : memref<8x4xf32, #tpu.memory_space<smem>>
    %30 = vector.broadcast %29 : f32 to vector<2x128xf32>
    %31 = arith.mulf %28, %30 : vector<2x128xf32>
    %32 = vector.extract_strided_slice %0 {offsets = [0, 1, 0], sizes = [2, 1, 128], strides = [1, 1, 1]} : vector<2x4x128xf32> to vector<2x1x128xf32>
    %33 = vector.shape_cast %32 : vector<2x1x128xf32> to vector<2x128xf32>
    %c1_10 = arith.constant 1 : index
    %c1_11 = arith.constant 1 : index
    %34 = memref.load %arg3[%c1_10, %c1_11] : memref<8x4xf32, #tpu.memory_space<smem>>
    %35 = vector.broadcast %34 : f32 to vector<2x128xf32>
    %36 = arith.mulf %33, %35 : vector<2x128xf32>
    %37 = arith.addf %31, %36 : vector<2x128xf32>
    %38 = vector.extract_strided_slice %0 {offsets = [0, 2, 0], sizes = [2, 1, 128], strides = [1, 1, 1]} : vector<2x4x128xf32> to vector<2x1x128xf32>
    %39 = vector.shape_cast %38 : vector<2x1x128xf32> to vector<2x128xf32>
    %c1_12 = arith.constant 1 : index
    %c2_13 = arith.constant 2 : index
    %40 = memref.load %arg3[%c1_12, %c2_13] : memref<8x4xf32, #tpu.memory_space<smem>>
    %41 = vector.broadcast %40 : f32 to vector<2x128xf32>
    %42 = arith.mulf %39, %41 : vector<2x128xf32>
    %43 = arith.addf %37, %42 : vector<2x128xf32>
    %44 = vector.extract_strided_slice %0 {offsets = [0, 3, 0], sizes = [2, 1, 128], strides = [1, 1, 1]} : vector<2x4x128xf32> to vector<2x1x128xf32>
    %45 = vector.shape_cast %44 : vector<2x1x128xf32> to vector<2x128xf32>
    %c1_14 = arith.constant 1 : index
    %c3_15 = arith.constant 3 : index
    %46 = memref.load %arg3[%c1_14, %c3_15] : memref<8x4xf32, #tpu.memory_space<smem>>
    %47 = vector.broadcast %46 : f32 to vector<2x128xf32>
    %48 = arith.mulf %45, %47 : vector<2x128xf32>
    %49 = arith.addf %43, %48 : vector<2x128xf32>
    %c1_16 = arith.constant 1 : index
    %50 = memref.load %arg4[%c1_16] : memref<8xf32, #tpu.memory_space<smem>>
    %51 = vector.broadcast %50 : f32 to vector<2x128xf32>
    %52 = arith.addf %49, %51 : vector<2x128xf32>
    %53 = vector.extract_strided_slice %0 {offsets = [0, 0, 0], sizes = [2, 1, 128], strides = [1, 1, 1]} : vector<2x4x128xf32> to vector<2x1x128xf32>
    %54 = vector.shape_cast %53 : vector<2x1x128xf32> to vector<2x128xf32>
    %c2_17 = arith.constant 2 : index
    %c0_18 = arith.constant 0 : index
    %55 = memref.load %arg3[%c2_17, %c0_18] : memref<8x4xf32, #tpu.memory_space<smem>>
    %56 = vector.broadcast %55 : f32 to vector<2x128xf32>
    %57 = arith.mulf %54, %56 : vector<2x128xf32>
    %58 = vector.extract_strided_slice %0 {offsets = [0, 1, 0], sizes = [2, 1, 128], strides = [1, 1, 1]} : vector<2x4x128xf32> to vector<2x1x128xf32>
    %59 = vector.shape_cast %58 : vector<2x1x128xf32> to vector<2x128xf32>
    %c2_19 = arith.constant 2 : index
    %c1_20 = arith.constant 1 : index
    %60 = memref.load %arg3[%c2_19, %c1_20] : memref<8x4xf32, #tpu.memory_space<smem>>
    %61 = vector.broadcast %60 : f32 to vector<2x128xf32>
    %62 = arith.mulf %59, %61 : vector<2x128xf32>
    %63 = arith.addf %57, %62 : vector<2x128xf32>
    %64 = vector.extract_strided_slice %0 {offsets = [0, 2, 0], sizes = [2, 1, 128], strides = [1, 1, 1]} : vector<2x4x128xf32> to vector<2x1x128xf32>
    %65 = vector.shape_cast %64 : vector<2x1x128xf32> to vector<2x128xf32>
    %c2_21 = arith.constant 2 : index
    %c2_22 = arith.constant 2 : index
    %66 = memref.load %arg3[%c2_21, %c2_22] : memref<8x4xf32, #tpu.memory_space<smem>>
    %67 = vector.broadcast %66 : f32 to vector<2x128xf32>
    %68 = arith.mulf %65, %67 : vector<2x128xf32>
    %69 = arith.addf %63, %68 : vector<2x128xf32>
    %70 = vector.extract_strided_slice %0 {offsets = [0, 3, 0], sizes = [2, 1, 128], strides = [1, 1, 1]} : vector<2x4x128xf32> to vector<2x1x128xf32>
    %71 = vector.shape_cast %70 : vector<2x1x128xf32> to vector<2x128xf32>
    %c2_23 = arith.constant 2 : index
    %c3_24 = arith.constant 3 : index
    %72 = memref.load %arg3[%c2_23, %c3_24] : memref<8x4xf32, #tpu.memory_space<smem>>
    %73 = vector.broadcast %72 : f32 to vector<2x128xf32>
    %74 = arith.mulf %71, %73 : vector<2x128xf32>
    %75 = arith.addf %69, %74 : vector<2x128xf32>
    %c2_25 = arith.constant 2 : index
    %76 = memref.load %arg4[%c2_25] : memref<8xf32, #tpu.memory_space<smem>>
    %77 = vector.broadcast %76 : f32 to vector<2x128xf32>
    %78 = arith.addf %75, %77 : vector<2x128xf32>
    %79 = vector.extract_strided_slice %0 {offsets = [0, 0, 0], sizes = [2, 1, 128], strides = [1, 1, 1]} : vector<2x4x128xf32> to vector<2x1x128xf32>
    %80 = vector.shape_cast %79 : vector<2x1x128xf32> to vector<2x128xf32>
    %c3_26 = arith.constant 3 : index
    %c0_27 = arith.constant 0 : index
    %81 = memref.load %arg3[%c3_26, %c0_27] : memref<8x4xf32, #tpu.memory_space<smem>>
    %82 = vector.broadcast %81 : f32 to vector<2x128xf32>
    %83 = arith.mulf %80, %82 : vector<2x128xf32>
    %84 = vector.extract_strided_slice %0 {offsets = [0, 1, 0], sizes = [2, 1, 128], strides = [1, 1, 1]} : vector<2x4x128xf32> to vector<2x1x128xf32>
    %85 = vector.shape_cast %84 : vector<2x1x128xf32> to vector<2x128xf32>
    %c3_28 = arith.constant 3 : index
    %c1_29 = arith.constant 1 : index
    %86 = memref.load %arg3[%c3_28, %c1_29] : memref<8x4xf32, #tpu.memory_space<smem>>
    %87 = vector.broadcast %86 : f32 to vector<2x128xf32>
    %88 = arith.mulf %85, %87 : vector<2x128xf32>
    %89 = arith.addf %83, %88 : vector<2x128xf32>
    %90 = vector.extract_strided_slice %0 {offsets = [0, 2, 0], sizes = [2, 1, 128], strides = [1, 1, 1]} : vector<2x4x128xf32> to vector<2x1x128xf32>
    %91 = vector.shape_cast %90 : vector<2x1x128xf32> to vector<2x128xf32>
    %c3_30 = arith.constant 3 : index
    %c2_31 = arith.constant 2 : index
    %92 = memref.load %arg3[%c3_30, %c2_31] : memref<8x4xf32, #tpu.memory_space<smem>>
    %93 = vector.broadcast %92 : f32 to vector<2x128xf32>
    %94 = arith.mulf %91, %93 : vector<2x128xf32>
    %95 = arith.addf %89, %94 : vector<2x128xf32>
    %96 = vector.extract_strided_slice %0 {offsets = [0, 3, 0], sizes = [2, 1, 128], strides = [1, 1, 1]} : vector<2x4x128xf32> to vector<2x1x128xf32>
    %97 = vector.shape_cast %96 : vector<2x1x128xf32> to vector<2x128xf32>
    %c3_32 = arith.constant 3 : index
    %c3_33 = arith.constant 3 : index
    %98 = memref.load %arg3[%c3_32, %c3_33] : memref<8x4xf32, #tpu.memory_space<smem>>
    %99 = vector.broadcast %98 : f32 to vector<2x128xf32>
    %100 = arith.mulf %97, %99 : vector<2x128xf32>
    %101 = arith.addf %95, %100 : vector<2x128xf32>
    %c3_34 = arith.constant 3 : index
    %102 = memref.load %arg4[%c3_34] : memref<8xf32, #tpu.memory_space<smem>>
    %103 = vector.broadcast %102 : f32 to vector<2x128xf32>
    %104 = arith.addf %101, %103 : vector<2x128xf32>
    %105 = vector.extract_strided_slice %0 {offsets = [0, 0, 0], sizes = [2, 1, 128], strides = [1, 1, 1]} : vector<2x4x128xf32> to vector<2x1x128xf32>
    %106 = vector.shape_cast %105 : vector<2x1x128xf32> to vector<2x128xf32>
    %c4 = arith.constant 4 : index
    %c0_35 = arith.constant 0 : index
    %107 = memref.load %arg3[%c4, %c0_35] : memref<8x4xf32, #tpu.memory_space<smem>>
    %108 = vector.broadcast %107 : f32 to vector<2x128xf32>
    %109 = arith.mulf %106, %108 : vector<2x128xf32>
    %110 = vector.extract_strided_slice %0 {offsets = [0, 1, 0], sizes = [2, 1, 128], strides = [1, 1, 1]} : vector<2x4x128xf32> to vector<2x1x128xf32>
    %111 = vector.shape_cast %110 : vector<2x1x128xf32> to vector<2x128xf32>
    %c4_36 = arith.constant 4 : index
    %c1_37 = arith.constant 1 : index
    %112 = memref.load %arg3[%c4_36, %c1_37] : memref<8x4xf32, #tpu.memory_space<smem>>
    %113 = vector.broadcast %112 : f32 to vector<2x128xf32>
    %114 = arith.mulf %111, %113 : vector<2x128xf32>
    %115 = arith.addf %109, %114 : vector<2x128xf32>
    %116 = vector.extract_strided_slice %0 {offsets = [0, 2, 0], sizes = [2, 1, 128], strides = [1, 1, 1]} : vector<2x4x128xf32> to vector<2x1x128xf32>
    %117 = vector.shape_cast %116 : vector<2x1x128xf32> to vector<2x128xf32>
    %c4_38 = arith.constant 4 : index
    %c2_39 = arith.constant 2 : index
    %118 = memref.load %arg3[%c4_38, %c2_39] : memref<8x4xf32, #tpu.memory_space<smem>>
    %119 = vector.broadcast %118 : f32 to vector<2x128xf32>
    %120 = arith.mulf %117, %119 : vector<2x128xf32>
    %121 = arith.addf %115, %120 : vector<2x128xf32>
    %122 = vector.extract_strided_slice %0 {offsets = [0, 3, 0], sizes = [2, 1, 128], strides = [1, 1, 1]} : vector<2x4x128xf32> to vector<2x1x128xf32>
    %123 = vector.shape_cast %122 : vector<2x1x128xf32> to vector<2x128xf32>
    %c4_40 = arith.constant 4 : index
    %c3_41 = arith.constant 3 : index
    %124 = memref.load %arg3[%c4_40, %c3_41] : memref<8x4xf32, #tpu.memory_space<smem>>
    %125 = vector.broadcast %124 : f32 to vector<2x128xf32>
    %126 = arith.mulf %123, %125 : vector<2x128xf32>
    %127 = arith.addf %121, %126 : vector<2x128xf32>
    %c4_42 = arith.constant 4 : index
    %128 = memref.load %arg4[%c4_42] : memref<8xf32, #tpu.memory_space<smem>>
    %129 = vector.broadcast %128 : f32 to vector<2x128xf32>
    %130 = arith.addf %127, %129 : vector<2x128xf32>
    %131 = vector.extract_strided_slice %0 {offsets = [0, 0, 0], sizes = [2, 1, 128], strides = [1, 1, 1]} : vector<2x4x128xf32> to vector<2x1x128xf32>
    %132 = vector.shape_cast %131 : vector<2x1x128xf32> to vector<2x128xf32>
    %c5 = arith.constant 5 : index
    %c0_43 = arith.constant 0 : index
    %133 = memref.load %arg3[%c5, %c0_43] : memref<8x4xf32, #tpu.memory_space<smem>>
    %134 = vector.broadcast %133 : f32 to vector<2x128xf32>
    %135 = arith.mulf %132, %134 : vector<2x128xf32>
    %136 = vector.extract_strided_slice %0 {offsets = [0, 1, 0], sizes = [2, 1, 128], strides = [1, 1, 1]} : vector<2x4x128xf32> to vector<2x1x128xf32>
    %137 = vector.shape_cast %136 : vector<2x1x128xf32> to vector<2x128xf32>
    %c5_44 = arith.constant 5 : index
    %c1_45 = arith.constant 1 : index
    %138 = memref.load %arg3[%c5_44, %c1_45] : memref<8x4xf32, #tpu.memory_space<smem>>
    %139 = vector.broadcast %138 : f32 to vector<2x128xf32>
    %140 = arith.mulf %137, %139 : vector<2x128xf32>
    %141 = arith.addf %135, %140 : vector<2x128xf32>
    %142 = vector.extract_strided_slice %0 {offsets = [0, 2, 0], sizes = [2, 1, 128], strides = [1, 1, 1]} : vector<2x4x128xf32> to vector<2x1x128xf32>
    %143 = vector.shape_cast %142 : vector<2x1x128xf32> to vector<2x128xf32>
    %c5_46 = arith.constant 5 : index
    %c2_47 = arith.constant 2 : index
    %144 = memref.load %arg3[%c5_46, %c2_47] : memref<8x4xf32, #tpu.memory_space<smem>>
    %145 = vector.broadcast %144 : f32 to vector<2x128xf32>
    %146 = arith.mulf %143, %145 : vector<2x128xf32>
    %147 = arith.addf %141, %146 : vector<2x128xf32>
    %148 = vector.extract_strided_slice %0 {offsets = [0, 3, 0], sizes = [2, 1, 128], strides = [1, 1, 1]} : vector<2x4x128xf32> to vector<2x1x128xf32>
    %149 = vector.shape_cast %148 : vector<2x1x128xf32> to vector<2x128xf32>
    %c5_48 = arith.constant 5 : index
    %c3_49 = arith.constant 3 : index
    %150 = memref.load %arg3[%c5_48, %c3_49] : memref<8x4xf32, #tpu.memory_space<smem>>
    %151 = vector.broadcast %150 : f32 to vector<2x128xf32>
    %152 = arith.mulf %149, %151 : vector<2x128xf32>
    %153 = arith.addf %147, %152 : vector<2x128xf32>
    %c5_50 = arith.constant 5 : index
    %154 = memref.load %arg4[%c5_50] : memref<8xf32, #tpu.memory_space<smem>>
    %155 = vector.broadcast %154 : f32 to vector<2x128xf32>
    %156 = arith.addf %153, %155 : vector<2x128xf32>
    %157 = vector.extract_strided_slice %0 {offsets = [0, 0, 0], sizes = [2, 1, 128], strides = [1, 1, 1]} : vector<2x4x128xf32> to vector<2x1x128xf32>
    %158 = vector.shape_cast %157 : vector<2x1x128xf32> to vector<2x128xf32>
    %c6 = arith.constant 6 : index
    %c0_51 = arith.constant 0 : index
    %159 = memref.load %arg3[%c6, %c0_51] : memref<8x4xf32, #tpu.memory_space<smem>>
    %160 = vector.broadcast %159 : f32 to vector<2x128xf32>
    %161 = arith.mulf %158, %160 : vector<2x128xf32>
    %162 = vector.extract_strided_slice %0 {offsets = [0, 1, 0], sizes = [2, 1, 128], strides = [1, 1, 1]} : vector<2x4x128xf32> to vector<2x1x128xf32>
    %163 = vector.shape_cast %162 : vector<2x1x128xf32> to vector<2x128xf32>
    %c6_52 = arith.constant 6 : index
    %c1_53 = arith.constant 1 : index
    %164 = memref.load %arg3[%c6_52, %c1_53] : memref<8x4xf32, #tpu.memory_space<smem>>
    %165 = vector.broadcast %164 : f32 to vector<2x128xf32>
    %166 = arith.mulf %163, %165 : vector<2x128xf32>
    %167 = arith.addf %161, %166 : vector<2x128xf32>
    %168 = vector.extract_strided_slice %0 {offsets = [0, 2, 0], sizes = [2, 1, 128], strides = [1, 1, 1]} : vector<2x4x128xf32> to vector<2x1x128xf32>
    %169 = vector.shape_cast %168 : vector<2x1x128xf32> to vector<2x128xf32>
    %c6_54 = arith.constant 6 : index
    %c2_55 = arith.constant 2 : index
    %170 = memref.load %arg3[%c6_54, %c2_55] : memref<8x4xf32, #tpu.memory_space<smem>>
    %171 = vector.broadcast %170 : f32 to vector<2x128xf32>
    %172 = arith.mulf %169, %171 : vector<2x128xf32>
    %173 = arith.addf %167, %172 : vector<2x128xf32>
    %174 = vector.extract_strided_slice %0 {offsets = [0, 3, 0], sizes = [2, 1, 128], strides = [1, 1, 1]} : vector<2x4x128xf32> to vector<2x1x128xf32>
    %175 = vector.shape_cast %174 : vector<2x1x128xf32> to vector<2x128xf32>
    %c6_56 = arith.constant 6 : index
    %c3_57 = arith.constant 3 : index
    %176 = memref.load %arg3[%c6_56, %c3_57] : memref<8x4xf32, #tpu.memory_space<smem>>
    %177 = vector.broadcast %176 : f32 to vector<2x128xf32>
    %178 = arith.mulf %175, %177 : vector<2x128xf32>
    %179 = arith.addf %173, %178 : vector<2x128xf32>
    %c6_58 = arith.constant 6 : index
    %180 = memref.load %arg4[%c6_58] : memref<8xf32, #tpu.memory_space<smem>>
    %181 = vector.broadcast %180 : f32 to vector<2x128xf32>
    %182 = arith.addf %179, %181 : vector<2x128xf32>
    %183 = vector.extract_strided_slice %0 {offsets = [0, 0, 0], sizes = [2, 1, 128], strides = [1, 1, 1]} : vector<2x4x128xf32> to vector<2x1x128xf32>
    %184 = vector.shape_cast %183 : vector<2x1x128xf32> to vector<2x128xf32>
    %c7 = arith.constant 7 : index
    %c0_59 = arith.constant 0 : index
    %185 = memref.load %arg3[%c7, %c0_59] : memref<8x4xf32, #tpu.memory_space<smem>>
    %186 = vector.broadcast %185 : f32 to vector<2x128xf32>
    %187 = arith.mulf %184, %186 : vector<2x128xf32>
    %188 = vector.extract_strided_slice %0 {offsets = [0, 1, 0], sizes = [2, 1, 128], strides = [1, 1, 1]} : vector<2x4x128xf32> to vector<2x1x128xf32>
    %189 = vector.shape_cast %188 : vector<2x1x128xf32> to vector<2x128xf32>
    %c7_60 = arith.constant 7 : index
    %c1_61 = arith.constant 1 : index
    %190 = memref.load %arg3[%c7_60, %c1_61] : memref<8x4xf32, #tpu.memory_space<smem>>
    %191 = vector.broadcast %190 : f32 to vector<2x128xf32>
    %192 = arith.mulf %189, %191 : vector<2x128xf32>
    %193 = arith.addf %187, %192 : vector<2x128xf32>
    %194 = vector.extract_strided_slice %0 {offsets = [0, 2, 0], sizes = [2, 1, 128], strides = [1, 1, 1]} : vector<2x4x128xf32> to vector<2x1x128xf32>
    %195 = vector.shape_cast %194 : vector<2x1x128xf32> to vector<2x128xf32>
    %c7_62 = arith.constant 7 : index
    %c2_63 = arith.constant 2 : index
    %196 = memref.load %arg3[%c7_62, %c2_63] : memref<8x4xf32, #tpu.memory_space<smem>>
    %197 = vector.broadcast %196 : f32 to vector<2x128xf32>
    %198 = arith.mulf %195, %197 : vector<2x128xf32>
    %199 = arith.addf %193, %198 : vector<2x128xf32>
    %200 = vector.extract_strided_slice %0 {offsets = [0, 3, 0], sizes = [2, 1, 128], strides = [1, 1, 1]} : vector<2x4x128xf32> to vector<2x1x128xf32>
    %201 = vector.shape_cast %200 : vector<2x1x128xf32> to vector<2x128xf32>
    %c7_64 = arith.constant 7 : index
    %c3_65 = arith.constant 3 : index
    %202 = memref.load %arg3[%c7_64, %c3_65] : memref<8x4xf32, #tpu.memory_space<smem>>
    %203 = vector.broadcast %202 : f32 to vector<2x128xf32>
    %204 = arith.mulf %201, %203 : vector<2x128xf32>
    %205 = arith.addf %199, %204 : vector<2x128xf32>
    %c7_66 = arith.constant 7 : index
    %206 = memref.load %arg4[%c7_66] : memref<8xf32, #tpu.memory_space<smem>>
    %207 = vector.broadcast %206 : f32 to vector<2x128xf32>
    %208 = arith.addf %205, %207 : vector<2x128xf32>
    %209 = vector.shape_cast %26 : vector<2x128xf32> to vector<2x1x128xf32>
    %210 = vector.shape_cast %52 : vector<2x128xf32> to vector<2x1x128xf32>
    %211 = vector.shape_cast %78 : vector<2x128xf32> to vector<2x1x128xf32>
    %212 = vector.shape_cast %104 : vector<2x128xf32> to vector<2x1x128xf32>
    %213 = vector.shape_cast %130 : vector<2x128xf32> to vector<2x1x128xf32>
    %214 = vector.shape_cast %156 : vector<2x128xf32> to vector<2x1x128xf32>
    %215 = vector.shape_cast %182 : vector<2x128xf32> to vector<2x1x128xf32>
    %216 = vector.shape_cast %208 : vector<2x128xf32> to vector<2x1x128xf32>
    %217 = tpu.concatenate %209, %210, %211, %212, %213, %214, %215, %216 in 1 : vector<2x1x128xf32>, vector<2x1x128xf32>, vector<2x1x128xf32>, vector<2x1x128xf32>, vector<2x1x128xf32>, vector<2x1x128xf32>, vector<2x1x128xf32>, vector<2x1x128xf32> -> vector<2x8x128xf32>
    %c0_67 = arith.constant 0 : index
    %c0_68 = arith.constant 0 : index
    %c0_69 = arith.constant 0 : index
    %218 = vector.load %arg5[%c0_67, %c0_68, %c0_69] : memref<2x8x128xf32, #tpu.memory_space<vmem>>, vector<2x8x128xf32>
    tpu.vector_store %arg5[%c0_67, %c0_68, %c0_69], %217 {strides = array<i32>} : memref<2x8x128xf32, #tpu.memory_space<vmem>>, vector<2x8x128xf32>,
    return
  }
  func.func @transform_0(%arg0: i32, %arg1: i32) -> (i32, i32, i32) {
    %c0_i32 = arith.constant 0 : i32
    %c0_i32_0 = arith.constant 0 : i32
    return %arg0, %c0_i32, %arg1 : i32, i32, i32
  }
  func.func @transform_1(%arg0: i32, %arg1: i32) -> (i32, i32) {
    %c0_i32 = arith.constant 0 : i32
    %c0_i32_0 = arith.constant 0 : i32
    %c0_i32_1 = arith.constant 0 : i32
    return %c0_i32, %c0_i32_0 : i32, i32
  }
  func.func @transform_2(%arg0: i32, %arg1: i32) -> i32 {
    %c0_i32 = arith.constant 0 : i32
    %c0_i32_0 = arith.constant 0 : i32
    return %c0_i32 : i32
  }
  func.func @transform_3(%arg0: i32, %arg1: i32) -> (i32, i32, i32) {
    %c0_i32 = arith.constant 0 : i32
    %c0_i32_0 = arith.constant 0 : i32
    return %arg0, %c0_i32, %arg1 : i32, i32, i32
  }
}

</mosaic_0001>

<bundles_post_ra>
// kernel: tpu_custom_call.1
= control target key start
LH: loop header
LB: loop body
LE: loop exit
PB: predicated region body
PF: predicated region fallthrough
CT: control target
= control target key end

     0   :  { %8 = vsyncpa [#allocation4], 0  ;;  %s830_s0 = inlined_call_operand.vmem [shape: f32[2,4,128], index: 0, kind: input, shape index: {}]   ;;  %s831_s1 = inlined_call_operand.vmem [shape: f32[8,4], index: 1, kind: input, shape index: {}]   ;;  %s832_s2 = inlined_call_operand.vmem [shape: f32[8], index: 2, kind: input, shape index: {}]   ;;  %s833_s3 = inlined_call_operand.hbm [shape: f32[2,8,128], index: 3, kind: output, shape index: {}]  }
   0x1   :  { %9 = vsyncpa [#allocation6], 0 }
   0x2   :  { %10 = vsyncpa [#allocation3], 0  ;;  %s18_s14 = sshll.u32 %s831_s1, 4  ;;  %s27_s17 = sshll.u32 %s832_s2, 4  ;;  %s19_s14 = int_to_ptr.vmem [resolvable:$true] %s18_s14  ;;  %s28_s17 = int_to_ptr.vmem [resolvable:$true] %s27_s17 }
   0x3   :  { %s576_s18 = smov [#allocation2]   ;;  %s577_s19 = smov [#allocation5]  }
   0x4   :  { %21 = dma.vmem_to_smem %s19_s14, 128, %s576_s18, [#allocation4]  }
   0x5   :  { %30 = dma.vmem_to_smem %s28_s17, 16, %s577_s19, [#allocation6]  }
   0x6   :  { %570 = dma.done.wait [#allocation4], 128  }
   0x7   :  { %571 = vsyncadd [#allocation4], 4294967168 }
   0x8   :  { %572 = dma.done.wait [#allocation6], 16  }
   0x9   :  { %573 = vsyncadd [#allocation6], 4294967280 }
   0xa   :  { %39 = sfence }
   0xb   :  { %s42_s20 = sld [smem:[#allocation2]]  ;;  %v614_v0 = vld [vmem:[%s830_s0] sm:$0xf]  ;;  %v621_v2 = vld [vmem:[%s830_s0 + $0x4] sm:$0xf]  ;;  %vm436_vm0 = vcmask 1040384  }
   0xc   :  { %s479_s21 = sld [smem:[#allocation2 + $0x1]]  ;;  %vm439_vm1 = vcmask 1041408   ;;  %vm442_vm2 = vcmask 1042432   ;;  %vm445_vm3 = vcmask 1043456   ;;  %vm448_vm4 = vcmask 1044480  }
   0xd   :  { %s480_s22 = sld [smem:[#allocation2 + $0x2]]  ;;  %vm451_vm5 = vcmask 1045504   ;;  %vm454_vm6 = vcmask 1046528  }
   0xe   :  { %s481_s23 = sld [smem:[#allocation2 + $0x3]] }
   0xf   :  { %s607_s1 = sld [smem:[#allocation5]] }
  0x10   :  { %s609_s24 = sld [smem:[#allocation2 + $0x80]] }
  0x11   :  { %v43_v1 = vstv %s42_s20  ;;  %s616_s26 = sld [smem:[#allocation2 + $0x81]] }
  0x12   :  { %v44_v3 = vmul.f32 %v43_v1, %v614_v0  ;;  %v47_v4 = vstv %s479_s21  ;;  %s624_s29 = sld [smem:[#allocation2 + $0x82]]  ;;  %v45_v5 = vmul.f32 %v43_v1, %v621_v2 }
  0x13   :  { %v48_v6 = vmul.f32 %v47_v4, %v614_v0  ;;  %v49_v7 = vmul.f32 %v47_v4, %v621_v2  ;;  %v59_v8 = vstv %s480_s22  ;;  %s629_s30 = sld [smem:[#allocation2 + $0x83]] }
  0x14   :  { %v60_v9 = vmul.f32 %v59_v8, %v614_v0  ;;  %v61_v10 = vmul.f32 %v59_v8, %v621_v2  ;;  %v71_v11 = vstv %s481_s23  ;;  %s633_s0 = sld [smem:[#allocation5 + $0x1]] }
  0x15   :  { %v52_v12 = vrot.slane %v48_v6, 1  ;;  %v53_v13 = vrot.slane %v49_v7, 1  ;;  %v72_v14 = vmul.f32 %v71_v11, %v614_v0  ;;  %v73_v15 = vmul.f32 %v71_v11, %v621_v2  ;;  %s637_s4 = sld [smem:[#allocation2 + $0x100]] }
  0x16   :  { %v64_v16 = vrot.slane %v60_v9, 2  ;;  %v65_v17 = vrot.slane %v61_v10, 2  ;;  %v83_v18 = vstv %s607_s1  ;;  %v87_v19 = vstv %s609_s24  ;;  %s641_s5 = sld [smem:[#allocation2 + $0x101]] }
  0x17   :  { %v56_v20 = vadd.f32 %v52_v12, %v44_v3  ;;  %v57_v21 = vadd.f32 %v53_v13, %v45_v5  ;;  %v76_v22 = vrot.slane %v72_v14, 3  ;;  %v77_v23 = vrot.slane %v73_v15, 3  ;;  %s643_s6 = sld [smem:[#allocation2 + $0x102]] }
  0x18   :  { %v88_v24 = vmul.f32 %v87_v19, %v614_v0  ;;  %v89_v25 = vmul.f32 %v87_v19, %v621_v2  ;;  %v91_v26 = vstv %s616_s26  ;;  %v103_v27 = vstv %s624_s29  ;;  %s649_s7 = sld [smem:[#allocation2 + $0x103]] }
  0x19   :  { %v68_v28 = vadd.f32 %v64_v16, %v56_v20  ;;  %v69_v29 = vadd.f32 %v65_v17, %v57_v21  ;;  %v92_v30 = vmul.f32 %v91_v26, %v614_v0  ;;  %v93_v31 = vmul.f32 %v91_v26, %v621_v2  ;;  %s657_s8 = sld [smem:[#allocation5 + $0x2]] }
  0x1a   :  { %v104_v32 = vmul.f32 %v103_v27, %v614_v0  ;;  %v105_v33 = vmul.f32 %v103_v27, %v621_v2  ;;  %v115_v34 = vstv %s629_s30  ;;  %v127_v35 = vstv %s633_s0  ;;  %s659_s9 = sld [smem:[#allocation2 + $0x180]] }
  0x1b   :  { %v80_v36 = vadd.f32 %v76_v22, %v68_v28  ;;  %v81_v37 = vadd.f32 %v77_v23, %v69_v29  ;;  %v96_v38 = vrot.slane %v92_v30, 1  ;;  %v97_v39 = vrot.slane %v93_v31, 1  ;;  %s663_s10 = sld [smem:[#allocation2 + $0x181]] }
  0x1c   :  { %v108_v40 = vrot.slane %v104_v32, 2  ;;  %v109_v41 = vrot.slane %v105_v33, 2  ;;  %v116_v42 = vmul.f32 %v115_v34, %v614_v0  ;;  %v117_v43 = vmul.f32 %v115_v34, %v621_v2  ;;  %s669_s11 = sld [smem:[#allocation2 + $0x182]] }
  0x1d   :  { %v665_v44 = vadd.f32 %v83_v18, %v80_v36  ;;  %v667_v45 = vadd.f32 %v83_v18, %v81_v37  ;;  %v100_v46 = vadd.f32 %v96_v38, %v88_v24  ;;  %v101_v47 = vadd.f32 %v97_v39, %v89_v25  ;;  %s675_s12 = sld [smem:[#allocation2 + $0x183]] }
  0x1e   :  { %v120_v48 = vrot.slane %v116_v42, 3  ;;  %v121_v49 = vrot.slane %v117_v43, 3  ;;  %v131_v50 = vstv %s637_s4  ;;  %v135_v51 = vstv %s641_s5  ;;  %s681_s13 = sld [smem:[#allocation5 + $0x3]]  ;;  %s578_s4 = smov [#allocation7]  }
  0x1f   :  { %v112_v52 = vadd.f32 %v108_v40, %v100_v46  ;;  %v113_v53 = vadd.f32 %v109_v41, %v101_v47  ;;  %v132_v54 = vmul.f32 %v131_v50, %v614_v0  ;;  %v133_v55 = vmul.f32 %v131_v50, %v621_v2  ;;  %s685_s14 = sld [smem:[#allocation2 + $0x200]]  ;;  %s463_s5 = sshll.u32 %s578_s4, 4  ;;  %s464_s5 = int_to_ptr.vmem [resolvable:$true] %s463_s5 }
  0x20   :  { %v136_v56 = vmul.f32 %v135_v51, %v614_v0  ;;  %v137_v57 = vmul.f32 %v135_v51, %v621_v2  ;;  %v147_v58 = vstv %s643_s6  ;;  %v159_v59 = vstv %s649_s7  ;;  %s689_s15 = sld [smem:[#allocation2 + $0x201]] }
  0x21   :  { %v124_v60 = vadd.f32 %v120_v48, %v112_v52  ;;  %v125_v61 = vadd.f32 %v121_v49, %v113_v53  ;;  %v148_v62 = vmul.f32 %v147_v58, %v614_v0  ;;  %v149_v63 = vmul.f32 %v147_v58, %v621_v2  ;;  %s695_s16 = sld [smem:[#allocation2 + $0x202]] }
  0x22   :  { %v140_v1 = vrot.slane %v136_v56, 1  ;;  %v141_v3 = vrot.slane %v137_v57, 1  ;;  %v160_v4 = vmul.f32 %v159_v59, %v614_v0  ;;  %v161_v5 = vmul.f32 %v159_v59, %v621_v2  ;;  %s697_s17 = sld [smem:[#allocation2 + $0x203]] }
  0x23   :  { %v691_v6 = vadd.f32 %v127_v35, %v124_v60  ;;  %v693_v7 = vadd.f32 %v127_v35, %v125_v61  ;;  %v152_v8 = vrot.slane %v148_v62, 2  ;;  %v153_v9 = vrot.slane %v149_v63, 2  ;;  %s703_s18 = sld [smem:[#allocation5 + $0x4]] }
  0x24   :  { %v144_v10 = vadd.f32 %v140_v1, %v132_v54  ;;  %v145_v11 = vadd.f32 %v141_v3, %v133_v55  ;;  %v164_v12 = vrot.slane %v160_v4, 3  ;;  %v165_v13 = vrot.slane %v161_v5, 3  ;;  %s707_s19 = sld [smem:[#allocation2 + $0x280]] }
  0x25   :  { %v171_v14 = vstv %s657_s8  ;;  %v175_v15 = vstv %s659_s9  ;;  %v179_v16 = vstv %s663_s10  ;;  %v191_v17 = vstv %s669_s11  ;;  %s721_s20 = sld [smem:[#allocation2 + $0x281]]  ;;  %s465_s8 = sshll.u32 %s833_s3, 4  ;;  %s466_s8 = int_to_ptr.hbm [resolvable:$true] %s465_s8 }
  0x26   :  { %v156_v18 = vadd.f32 %v152_v8, %v144_v10  ;;  %v157_v19 = vadd.f32 %v153_v9, %v145_v11  ;;  %v176_v20 = vmul.f32 %v175_v15, %v614_v0  ;;  %v177_v21 = vmul.f32 %v175_v15, %v621_v2  ;;  %s725_s21 = sld [smem:[#allocation2 + $0x282]]  ;;  %s579_s9 = smov 128  }
  0x27   :  { %v180_v22 = vmul.f32 %v179_v16, %v614_v0  ;;  %v181_v23 = vmul.f32 %v179_v16, %v621_v2  ;;  %v192_v24 = vmul.f32 %v191_v17, %v614_v0  ;;  %v193_v25 = vmul.f32 %v191_v17, %v621_v2  ;;  %s729_s22 = sld [smem:[#allocation2 + $0x283]]  ;;  %s580_s10 = smov 8  }
  0x28   :  { %v168_v26 = vadd.f32 %v164_v12, %v156_v18  ;;  %v169_v27 = vadd.f32 %v165_v13, %v157_v19  ;;  %v203_v28 = vstv %s675_s12  ;;  %v215_v29 = vstv %s681_s13  ;;  %s733_s23 = sld [smem:[#allocation5 + $0x5]] }
  0x29   :  { %v184_v30 = vrot.slane %v180_v22, 1  ;;  %v185_v31 = vrot.slane %v181_v23, 1  ;;  %v196_v32 = vrot.slane %v192_v24, 2  ;;  %v197_v33 = vrot.slane %v193_v25, 2  ;;  %s743_s1 = sld [smem:[#allocation2 + $0x300]] }
  0x2a   :  { %v715_v34 = vadd.f32 %v171_v14, %v168_v26  ;;  %v717_v35 = vadd.f32 %v171_v14, %v169_v27  ;;  %v204_v36 = vmul.f32 %v203_v28, %v614_v0  ;;  %v205_v37 = vmul.f32 %v203_v28, %v621_v2  ;;  %s749_s24 = sld [smem:[#allocation2 + $0x301]] }
  0x2b   :  { %v188_v38 = vadd.f32 %v184_v30, %v176_v20  ;;  %v189_v39 = vadd.f32 %v185_v31, %v177_v21  ;;  %v219_v40 = vstv %s685_s14  ;;  %v223_v41 = vstv %s689_s15  ;;  %s751_s25 = sld [smem:[#allocation2 + $0x302]] }
  0x2c   :  { %v208_v42 = vrot.slane %v204_v36, 3  ;;  %v209_v43 = vrot.slane %v205_v37, 3  ;;  %v220_v46 = vmul.f32 %v219_v40, %v614_v0  ;;  %v221_v47 = vmul.f32 %v219_v40, %v621_v2  ;;  %s757_s2 = sld [smem:[#allocation2 + $0x303]] }
  0x2d   :  { %v200_v48 = vadd.f32 %v196_v32, %v188_v38  ;;  %v201_v49 = vadd.f32 %v197_v33, %v189_v39  ;;  %v224_v50 = vmul.f32 %v223_v41, %v614_v0  ;;  %v225_v51 = vmul.f32 %v223_v41, %v621_v2  ;;  %s765_s26 = sld [smem:[#allocation5 + $0x6]] }
  0x2e   :  { %v235_v52 = vstv %s695_s16  ;;  %v247_v53 = vstv %s697_s17  ;;  %v259_v54 = vstv %s703_s18  ;;  %v263_v55 = vstv %s707_s19  ;;  %s767_s27 = sld [smem:[#allocation2 + $0x380]] }
  0x2f   :  { %v212_v56 = vadd.f32 %v208_v42, %v200_v48  ;;  %v213_v57 = vadd.f32 %v209_v43, %v201_v49  ;;  %v228_v58 = vrot.slane %v224_v50, 1  ;;  %v229_v59 = vrot.slane %v225_v51, 1  ;;  %s771_s28 = sld [smem:[#allocation2 + $0x381]] }
  0x30   :  { %v236_v60 = vmul.f32 %v235_v52, %v614_v0  ;;  %v237_v61 = vmul.f32 %v235_v52, %v621_v2  ;;  %v248_v62 = vmul.f32 %v247_v53, %v614_v0  ;;  %v249_v63 = vmul.f32 %v247_v53, %v621_v2  ;;  %s777_s29 = sld [smem:[#allocation2 + $0x382]] }
  0x31   :  { %v745_v1 = vadd.f32 %v215_v29, %v212_v56  ;;  %v747_v3 = vadd.f32 %v215_v29, %v213_v57  ;;  %v232_v4 = vadd.f32 %v228_v58, %v220_v46  ;;  %v233_v5 = vadd.f32 %v229_v59, %v221_v47  ;;  %s783_s30 = sld [smem:[#allocation2 + $0x383]] }
  0x32   :  { %v240_v8 = vrot.slane %v236_v60, 2  ;;  %v241_v9 = vrot.slane %v237_v61, 2  ;;  %v252_v10 = vrot.slane %v248_v62, 3  ;;  %v253_v11 = vrot.slane %v249_v63, 3  ;;  %s789_s0 = sld [smem:[#allocation5 + $0x7]] }
  0x33   :  { %v264_v12 = vmul.f32 %v263_v55, %v614_v0  ;;  %v265_v13 = vmul.f32 %v263_v55, %v621_v2  ;;  %v267_v14 = vstv %s721_s20  ;;  %v279_v15 = vstv %s725_s21 }
  0x34   :  { %v244_v16 = vadd.f32 %v240_v8, %v232_v4  ;;  %v245_v17 = vadd.f32 %v241_v9, %v233_v5  ;;  %v268_v18 = vmul.f32 %v267_v14, %v614_v0  ;;  %v269_v19 = vmul.f32 %v267_v14, %v621_v2 }
  0x35   :  { %v280_v20 = vmul.f32 %v279_v15, %v614_v0  ;;  %v281_v21 = vmul.f32 %v279_v15, %v621_v2  ;;  %v291_v22 = vstv %s729_s22  ;;  %v303_v23 = vstv %s733_s23 }
  0x36   :  { %v256_v24 = vadd.f32 %v252_v10, %v244_v16  ;;  %v257_v25 = vadd.f32 %v253_v11, %v245_v17  ;;  %v272_v26 = vrot.slane %v268_v18, 1  ;;  %v273_v27 = vrot.slane %v269_v19, 1 }
  0x37   :  { %v284_v28 = vrot.slane %v280_v20, 2  ;;  %v285_v29 = vrot.slane %v281_v21, 2  ;;  %v292_v30 = vmul.f32 %v291_v22, %v614_v0  ;;  %v293_v31 = vmul.f32 %v291_v22, %v621_v2 }
  0x38   :  { %v773_v32 = vadd.f32 %v259_v54, %v256_v24  ;;  %v775_v33 = vadd.f32 %v259_v54, %v257_v25  ;;  %v276_v36 = vadd.f32 %v272_v26, %v264_v12  ;;  %v277_v37 = vadd.f32 %v273_v27, %v265_v13 }
  0x39   :  { %v296_v38 = vrot.slane %v292_v30, 3  ;;  %v297_v39 = vrot.slane %v293_v31, 3  ;;  %v307_v40 = vstv %s743_s1  ;;  %v311_v41 = vstv %s749_s24 }
  0x3a   :  { %v288_v42 = vadd.f32 %v284_v28, %v276_v36  ;;  %v289_v43 = vadd.f32 %v285_v29, %v277_v37  ;;  %v308_v46 = vmul.f32 %v307_v40, %v614_v0  ;;  %v309_v47 = vmul.f32 %v307_v40, %v621_v2 }
  0x3b   :  { %v312_v48 = vmul.f32 %v311_v41, %v614_v0  ;;  %v313_v49 = vmul.f32 %v311_v41, %v621_v2  ;;  %v323_v50 = vstv %s751_s25  ;;  %v335_v51 = vstv %s757_s2 }
  0x3c   :  { %v300_v52 = vadd.f32 %v296_v38, %v288_v42  ;;  %v301_v53 = vadd.f32 %v297_v39, %v289_v43  ;;  %v324_v54 = vmul.f32 %v323_v50, %v614_v0  ;;  %v325_v55 = vmul.f32 %v323_v50, %v621_v2 }
  0x3d   :  { %v316_v56 = vrot.slane %v312_v48, 1  ;;  %v317_v57 = vrot.slane %v313_v49, 1  ;;  %v336_v58 = vmul.f32 %v335_v51, %v614_v0  ;;  %v337_v59 = vmul.f32 %v335_v51, %v621_v2 }
  0x3e   :  { %v795_v60 = vadd.f32 %v303_v23, %v300_v52  ;;  %v797_v61 = vadd.f32 %v303_v23, %v301_v53  ;;  %v328_v62 = vrot.slane %v324_v54, 2  ;;  %v329_v63 = vrot.slane %v325_v55, 2 }
  0x3f   :  { %v320_v4 = vadd.f32 %v316_v56, %v308_v46  ;;  %v321_v5 = vadd.f32 %v317_v57, %v309_v47  ;;  %v340_v8 = vrot.slane %v336_v58, 3  ;;  %v341_v9 = vrot.slane %v337_v59, 3 }
  0x40   :  { %v347_v10 = vstv %s765_s26  ;;  %v351_v11 = vstv %s767_s27  ;;  %v355_v12 = vstv %s771_s28  ;;  %v367_v13 = vstv %s777_s29 }
  0x41   :  { %v332_v14 = vadd.f32 %v328_v62, %v320_v4  ;;  %v333_v15 = vadd.f32 %v329_v63, %v321_v5  ;;  %v352_v16 = vmul.f32 %v351_v11, %v614_v0  ;;  %v353_v17 = vmul.f32 %v351_v11, %v621_v2 }
  0x42   :  { %v356_v18 = vmul.f32 %v355_v12, %v614_v0  ;;  %v357_v19 = vmul.f32 %v355_v12, %v621_v2  ;;  %v368_v20 = vmul.f32 %v367_v13, %v614_v0  ;;  %v369_v21 = vmul.f32 %v367_v13, %v621_v2 }
  0x43   :  { %v344_v22 = vadd.f32 %v340_v8, %v332_v14  ;;  %v345_v23 = vadd.f32 %v341_v9, %v333_v15  ;;  %v379_v24 = vstv %s783_s30  ;;  %v391_v25 = vstv %s789_s0 }
  0x44   :  { %v360_v26 = vrot.slane %v356_v18, 1  ;;  %v361_v27 = vrot.slane %v357_v19, 1  ;;  %v372_v28 = vrot.slane %v368_v20, 2  ;;  %v373_v29 = vrot.slane %v369_v21, 2 }
  0x45   :  { %v348_v30 = vadd.f32 %v347_v10, %v344_v22  ;;  %v349_v31 = vadd.f32 %v347_v10, %v345_v23  ;;  %v380_v36 = vmul.f32 %v379_v24, %v614_v0  ;;  %v381_v37 = vmul.f32 %v379_v24, %v621_v2 }
  0x46   :  { %v364_v38 = vadd.f32 %v360_v26, %v352_v16  ;;  %v365_v39 = vadd.f32 %v361_v27, %v353_v17  ;;  %v396_v40 = vrot.slane %v691_v6, 7  ;;  %v397_v41 = vrot.slane %v693_v7, 7 }
  0x47   :  { %v384_v42 = vrot.slane %v380_v36, 3  ;;  %v385_v43 = vrot.slane %v381_v37, 3  ;;  %v402_v46 = vrot.slane %v715_v34, 6  ;;  %v403_v47 = vrot.slane %v717_v35, 6 }
  0x48   :  { %v376_v48 = vadd.f32 %v372_v28, %v364_v38  ;;  %v377_v49 = vadd.f32 %v373_v29, %v365_v39  ;;  %v408_v50 = vrot.slane %v745_v1, 5  ;;  %v409_v0 = vrot.slane %v747_v3, 5 }
  0x49   :  { %v414_v2 = vrot.slane %v773_v32, 4  ;;  %v415_v51 = vrot.slane %v775_v33, 4  ;;  %v420_v6 = vrot.slane %v795_v60, 3  ;;  %v421_v7 = vrot.slane %v797_v61, 3 }
  0x4a   :  { %v388_v52 = vadd.f32 %v384_v42, %v376_v48  ;;  %v389_v53 = vadd.f32 %v385_v43, %v377_v49  ;;  %v426_v54 = vrot.slane %v348_v30, 2  ;;  %v427_v34 = vrot.slane %v349_v31, 2 }
  0x4b   :  { %v437_v3 = vsel %vm436_vm0, %v665_v44, %v396_v40  ;;  %v438_v32 = vsel %vm436_vm0, %v667_v45, %v397_v41 }
  0x4c   :  { %v392_v35 = vadd.f32 %v391_v25, %v388_v52  ;;  %v393_v1 = vadd.f32 %v391_v25, %v389_v53  ;;  %v440_v55 = vsel %vm439_vm1, %v437_v3, %v402_v46  ;;  %v441_v33 = vsel %vm439_vm1, %v438_v32, %v403_v47 }
  0x4d   :  { %v443_v58 = vsel %vm442_vm2, %v440_v55, %v408_v50  ;;  %v444_v59 = vsel %vm442_vm2, %v441_v33, %v409_v0 }
  0x4e   :  { %v432_v56 = vrot.slane %v392_v35, 1  ;;  %v433_v57 = vrot.slane %v393_v1, 1  ;;  %v446_v60 = vsel %vm445_vm3, %v443_v58, %v414_v2  ;;  %v447_v44 = vsel %vm445_vm3, %v444_v59, %v415_v51 }
  0x4f   :  { %v449_v45 = vsel %vm448_vm4, %v446_v60, %v420_v6  ;;  %v450_v61 = vsel %vm448_vm4, %v447_v44, %v421_v7 }
  0x50   :  { %v452_v62 = vsel %vm451_vm5, %v449_v45, %v426_v54  ;;  %v453_v63 = vsel %vm451_vm5, %v450_v61, %v427_v34 }
  0x51   :  { %v455_v4 = vsel %vm454_vm6, %v452_v62, %v432_v56  ;;  %v456_v5 = vsel %vm454_vm6, %v453_v63, %v433_v57 }
  0x52   :  { %457 = vst [vmem:[#allocation7] sm:$0xff] %v455_v4 }
  0x53   :  { %458 = vst [vmem:[#allocation7 + $0x8] sm:$0xff] %v456_v5 }
  0x54   :  { %471 = dma.vmem_to_hbm [thread:$0]  %s464_s5, 256, %s466_s8, [#allocation3], %s579_s9, %s579_s9, %s580_s10  }
  0x55   :  { %574 = dma.done.wait [#allocation3], 256  }
  0x56   :  { %575 = vsyncadd [#allocation3], 4294967040 }
  0x57   :  { %476 = vsyncpa [#allocation3], 1 }
  0x58   :  { %477 = vsyncpa [#allocation4], 1 }
  0x59   :  { %478 = vsyncpa [#allocation6], 1 }

</bundles_post_ra>
